<compile_context>
chip_gen: v6e
topology: v6e:2x2x1
jax: 0.10.0
libtpu: 0.0.40
codegen_flags: <defaults>
</compile_context>

<pallas_src>
import jax
import jax.numpy as jnp
from jax.experimental import pallas as pl
from jax.experimental.pallas import tpu as pltpu

BETA = 1.0
THRESHOLD = 20.0

_LANES = 128


def _sublanes_for(dtype) -> int:
    # f32 -> 8, bf16/f16 -> 16, int8/fp8 -> 32
    itemsize = jnp.dtype(dtype).itemsize
    return max(8, 32 // max(itemsize, 1))


def _shifted_softplus_math(x):
    # softplus(x - 1) with torch's threshold semantics; compute in f32.
    z = x.astype(jnp.float32) - 1.0
    bz = BETA * z
    # clamp the exp argument so the unselected branch never produces inf/nan
    sp = jnp.log1p(jnp.exp(jnp.minimum(bz, THRESHOLD))) / BETA
    return jnp.where(bz > THRESHOLD, z, sp)


def _shifted_softplus_kernel(x_ref, o_ref):
    o_ref[...] = _shifted_softplus_math(x_ref[...]).astype(o_ref.dtype)


def shifted_softplus(
    x: jnp.ndarray,
    *,
    tile_rows: int = 4096,
    small_input_fallback: bool = True,
    small_input_elems: int = 1 << 16,
) -> jnp.ndarray:
    """Pallas TPU implementation of F.softplus(x - 1, beta=1, threshold=20)."""
    orig_shape = x.shape
    orig_dtype = x.dtype
    n = x.size

    # Pure-JAX path for tiny inputs: pallas_call launch overhead dwarfs the work.
    if small_input_fallback and n < small_input_elems:
        return _shifted_softplus_math(x).astype(orig_dtype)

    flat = x.reshape(-1)

    # Pad only to a multiple of 128 lanes (not 8*128); skip entirely if already aligned.
    padded_n = ((n + _LANES - 1) // _LANES) * _LANES
    padded = padded_n != n
    if padded:
        flat = jnp.pad(flat, (0, padded_n - n))

    rows = padded_n // _LANES
    x2d = flat.reshape(rows, _LANES)

    # Dtype-aware sublane alignment for the row-tile.
    sublanes = _sublanes_for(orig_dtype)
    tr = max(sublanes, (tile_rows // sublanes) * sublanes)
    if tr >= rows:
        # Single block covering the whole (possibly non-8-multiple) array is allowed.
        tr = rows

    grid = (pl.cdiv(rows, tr),)

    out2d = pl.pallas_call(
        _shifted_softplus_kernel,
        out_shape=jax.ShapeDtypeStruct((rows, _LANES), orig_dtype),
        grid_spec=pltpu.PrefetchScalarGridSpec(
            num_scalar_prefetch=0,
            grid=grid,
            in_specs=[pl.BlockSpec((tr, _LANES), lambda i: (i, 0))],
            out_specs=pl.BlockSpec((tr, _LANES), lambda i: (i, 0)),
        ),
        compiler_params=pltpu.CompilerParams(
            dimension_semantics=("parallel",),
        ),
    )(x2d)

    out_flat = out2d.reshape(-1)
    if padded:
        out_flat = out_flat[:n]
    return out_flat.reshape(orig_shape)


def _reference(x):
    # pure-JAX reference of torch.nn.functional.softplus(x - 1, beta=1, threshold=20)
    return _shifted_softplus_math(x).astype(x.dtype)


if __name__ == "__main__":
    key = jax.random.PRNGKey(0)
    # NCHW-like small input consistent with a NeRF activation usage
    x = jax.random.normal(key, (2, 4, 16, 16), dtype=jnp.float32) * 10.0

    # Force the Pallas path (the small-input fallback would otherwise take over here).
    y = shifted_softplus(x, small_input_fallback=False)
    jax.block_until_ready(y)

    y_ref = _reference(x)
    assert y.shape == x.shape and y.dtype == x.dtype
    assert jnp.allclose(y, y_ref, atol=1e-5, rtol=1e-5), "mismatch vs reference"

    # Also sanity-check a larger, non-tile-divisible size through the full tiled path.
    x2 = jax.random.normal(jax.random.PRNGKey(1), (3, 5000), dtype=jnp.float32) * 10.0
    y2 = shifted_softplus(x2, tile_rows=64, small_input_fallback=False)
    jax.block_until_ready(y2)
    assert jnp.allclose(y2, _reference(x2), atol=1e-5, rtol=1e-5), "mismatch (ragged path)"

    print("KERNEL_OK")
</pallas_src>

<mosaic_0001>
module attributes {stable_mosaic.version = 11 : i64} {
  func.func @_shifted_softplus_kernel(%arg0: i32, %arg1: memref<16x128xf32, #tpu.memory_space<vmem>>, %arg2: memref<16x128xf32, #tpu.memory_space<vmem>>) attributes {dimension_semantics = [#tpu.dimension_semantics<parallel>], iteration_bounds = array<i64: 1>, scalar_prefetch = 0 : i64, scratch_operands = 0 : i64, tpu.core_type = #tpu.core_type<tc>, window_params = [{transform_indices = @transform_0, window_bounds = array<i64: 16, 128>}, {transform_indices = @transform_1, window_bounds = array<i64: 16, 128>}]} {
    %c0 = arith.constant 0 : index
    %c0_0 = arith.constant 0 : index
    %0 = vector.load %arg1[%c0, %c0_0] : memref<16x128xf32, #tpu.memory_space<vmem>>, vector<16x128xf32>
    %cst = arith.constant 1.000000e+00 : f32
    %1 = vector.broadcast %cst : f32 to vector<16x128xf32>
    %2 = arith.subf %0, %1 : vector<16x128xf32>
    %cst_1 = arith.constant 1.000000e+00 : f32
    %3 = vector.broadcast %cst_1 : f32 to vector<16x128xf32>
    %4 = arith.mulf %3, %2 : vector<16x128xf32>
    %cst_2 = arith.constant 2.000000e+01 : f32
    %5 = vector.broadcast %cst_2 : f32 to vector<16x128xf32>
    %6 = arith.minimumf %4, %5 : vector<16x128xf32>
    %7 = math.exp %6 : vector<16x128xf32>
    %8 = math.log1p %7 : vector<16x128xf32>
    %cst_3 = arith.constant 1.000000e+00 : f32
    %9 = vector.broadcast %cst_3 : f32 to vector<16x128xf32>
    %10 = arith.divf %8, %9 : vector<16x128xf32>
    %cst_4 = arith.constant 2.000000e+01 : f32
    %11 = vector.broadcast %cst_4 : f32 to vector<16x128xf32>
    %12 = arith.cmpf ogt, %4, %11 : vector<16x128xf32>
    %13 = arith.select %12, %2, %10 : vector<16x128xi1>, vector<16x128xf32>
    %c0_5 = arith.constant 0 : index
    %c0_6 = arith.constant 0 : index
    %14 = vector.load %arg2[%c0_5, %c0_6] : memref<16x128xf32, #tpu.memory_space<vmem>>, vector<16x128xf32>
    tpu.vector_store %arg2[%c0_5, %c0_6], %13 {strides = array<i32>} : memref<16x128xf32, #tpu.memory_space<vmem>>, vector<16x128xf32>,
    return
  }
  func.func @transform_0(%arg0: i32) -> (i32, i32) {
    %c0_i32 = arith.constant 0 : i32
    %c0_i32_0 = arith.constant 0 : i32
    return %arg0, %c0_i32 : i32, i32
  }
  func.func @transform_1(%arg0: i32) -> (i32, i32) {
    %c0_i32 = arith.constant 0 : i32
    %c0_i32_0 = arith.constant 0 : i32
    return %arg0, %c0_i32 : i32, i32
  }
}

</mosaic_0001>

<bundles_post_ra>
// kernel: tpu_custom_call.1
= control target key start
LH: loop header
LB: loop body
LE: loop exit
PB: predicated region body
PF: predicated region fallthrough
CT: control target
= control target key end

     0   :  { %6 = vsyncpa [#allocation3], 0  ;;  %s158_s0 = inlined_call_operand.hbm [shape: f32[16,128], index: 0, kind: input, shape index: {}]   ;;  %s159_s1 = inlined_call_operand.hbm [shape: f32[16,128], index: 1, kind: output, shape index: {}]  }
   0x1   :  { %7 = vsyncpa [#allocation4], 0  ;;  %s132_s6 = smov [#allocation2]  }
   0x2   :  { %s13_s7 = sshll.u32 %s132_s6, 4  ;;  %s14_s7 = int_to_ptr.vmem [resolvable:$true] %s13_s7 }
   0x3   :  { %s96_s8 = scalar_lea.vmem %s14_s7, 256  ;;  %p101_p1 = scmp.lt.s32.totalorder %s14_s7, %s14_s7 }
   0x4   :  { %p97_p0 = scmp.ne.s32.totalorder %s14_s7, %s96_s8  ;;  %p102_p2 = scmp.lt.s32.totalorder %s96_s8, %s96_s8 }
   0x6   :  { %p103_p3 = por %p102_p2, %p101_p1 }
   0x8   :  { %p104_p4 = pnand %p103_p3, %p97_p0 }
   0xa   :  { %107 = shalt.err (!%p104_p4)
}
   0xb   :  { %s133_s9 = smov 128   ;;  %s134_s10 = smov 8  }
   0xc   :  { %19 = dma.hbm_to_vmem [thread:$0]  %s158_s0, 256, %s14_s7, [#allocation3], %s133_s9, %s133_s9, %s134_s10  }
   0xd   :  { %128 = dma.done.wait [#allocation3], 256  }
   0xe   :  { %129 = vsyncadd [#allocation3], 4294967040  ;;  %v23_v0 = vld [vmem:[#allocation2] sm:$0xff]  ;;  %v24_v1 = vld [vmem:[#allocation2 + $0x8] sm:$0xff]  ;;  %s135_s0 = smov [#allocation5]  }
   0xf   :  { %v74_v2 = vadd.f32 -1.0, %v23_v0  ;;  %v75_v3 = vadd.f32 -1.0, %v24_v1  ;;  %s62_s13 = sshll.u32 %s135_s0, 4  ;;  %s63_s13 = int_to_ptr.vmem [resolvable:$true] %s62_s13 }
  0x10   :  { %s108_s14 = scalar_lea.vmem %s63_s13, 256  ;;  %p113_p6 = scmp.lt.s32.totalorder %s63_s13, %s63_s13 }
  0x11   :  { %v27_v4 = vmin.f32 %v74_v2, 20.0  ;;  %v28_v5 = vmin.f32 %v75_v3, 20.0  ;;  %vm51_vm1 = vcmp.gt.f32.partialorder %v74_v2, 20.0  ;;  %vm52_vm3 = vcmp.gt.f32.partialorder %v75_v3, 20.0  ;;  %p109_p5 = scmp.ne.s32.totalorder %s63_s13, %s108_s14  ;;  %p114_p7 = scmp.lt.s32.totalorder %s108_s14, %s108_s14 }
  0x13   :  { %v29_v6 = vmul.f32 1.442695, %v27_v4  ;;  %v31_v7 = vmul.f32 1.442695, %v28_v5  ;;  %p115_p8 = por %p114_p7, %p113_p6 }
  0x15   :  { %80 = vpow2.f32 %v29_v6  ;;  %p116_p9 = pnand %p115_p8, %p109_p5 }
  0x16   :  { %82 = vpow2.f32 %v31_v7 }
  0x22   :  { %v81_v8 = vpop.eup %80 }
  0x23   :  { %v83_v9 = vpop.eup %82  ;;  %v33_v10 = vadd.f32 1.0, %v81_v8  ;;  %v36_v12 = vmul.f32 -0.5, %v81_v8  ;;  %v39_v15 = vand.u32 2147483647, %v81_v8 }
  0x24   :  { %v42_v11 = vadd.f32 1.0, %v83_v9  ;;  %v45_v13 = vmul.f32 -0.5, %v83_v9  ;;  %v48_v17 = vand.u32 2147483647, %v83_v9 }
  0x25   :  { %84 = vlog2.f32 %v33_v10  ;;  %v37_v14 = vadd.f32 1.0, %v36_v12  ;;  %vm40_vm0 = vcmp.lt.f32.partialorder %v39_v15, 0.0004427343 }
  0x26   :  { %86 = vlog2.f32 %v42_v11  ;;  %v46_v16 = vadd.f32 1.0, %v45_v13  ;;  %vm49_vm2 = vcmp.lt.f32.partialorder %v48_v17, 0.0004427343 }
  0x27   :  { %v38_v18 = vmul.f32 %v81_v8, %v37_v14 }
  0x28   :  { %v47_v20 = vmul.f32 %v83_v9, %v46_v16 }
  0x32   :  { %v85_v19 = vpop.eup %84 }
  0x33   :  { %v87_v21 = vpop.eup %86  ;;  %v35_v22 = vmul.f32 0.6931472, %v85_v19 }
  0x34   :  { %v44_v23 = vmul.f32 0.6931472, %v87_v21 }
  0x35   :  { %v41_v24 = vsel %vm40_vm0, %v38_v18, %v35_v22 }
  0x36   :  { %v53_v25 = vsel %vm51_vm1, %v74_v2, %v41_v24  ;;  %v50_v26 = vsel %vm49_vm2, %v47_v20, %v44_v23 }
  0x37   :  { %55 = vst [vmem:[#allocation5] sm:$0xff] %v53_v25  ;;  %v54_v27 = vsel %vm52_vm3, %v75_v3, %v50_v26 }
  0x38   :  { %56 = vst [vmem:[#allocation5 + $0x8] sm:$0xff] %v54_v27 }
  0x39   :  { %119 = shalt.err (!%p116_p9)
}
  0x3a   :  { %68 = dma.vmem_to_hbm [thread:$0]  %s63_s13, 256, %s159_s1, [#allocation4], %s133_s9, %s133_s9, %s134_s10  }
  0x3b   :  { %130 = dma.done.wait [#allocation4], 256  }
  0x3c   :  { %131 = vsyncadd [#allocation4], 4294967040 }
  0x3d   :  { %72 = vsyncpa [#allocation3], 1 }
  0x3e   :  { %73 = vsyncpa [#allocation4], 1 }

</bundles_post_ra>
